<compile_context>
chip_gen: v7x
topology: tpu7x:2x2x1
jax: 0.10.0
libtpu: 0.0.40
codegen_flags: <defaults>
</compile_context>

<pallas_src>
import jax
import jax.numpy as jnp
from jax.experimental import pallas as pl
from jax.experimental.pallas import tpu as pltpu


def _leaky_relu(x, slope=0.2):
    return jnp.where(x > 0, x, slope * x)


def _round_up(n, m):
    return ((n + m - 1) // m) * m


def _tensorcores_per_chip():
    """Best-effort TensorCores-per-chip query (v7x: 2, v5e/v6e: 1)."""
    try:
        info = pltpu.get_tpu_info()
    except Exception:
        return 1
    for name in ("num_cores", "core_count", "num_tensorcores",
                 "tensorcores_per_chip", "cores_per_chip"):
        v = getattr(info, name, None)
        if v is None:
            continue
        try:
            v = int(v)
        except (TypeError, ValueError):
            continue
        if v >= 1:
            return v
    return 1


def disc_kernel(x_ref,
                w0_ref, b0_ref,
                w1_ref, b1_ref,
                w2_ref, b2_ref,
                w3_ref, b3_ref,
                o_ref):
    """Fused 784->128->64->32->1 MLP; bf16 MXU matmuls, f32 accumulate/VPU."""
    # x arrives as f32 straight from HBM (single pass over the dominant
    # stream); cast to bf16 here on the VPU, which has ample slack.
    x = x_ref[...].astype(jnp.bfloat16)                   # (tile_b, 784)

    h = jnp.dot(x, w0_ref[...],
                preferred_element_type=jnp.float32) + b0_ref[...]
    h = _leaky_relu(h)                                    # f32; dropout = id

    h = jnp.dot(h.astype(jnp.bfloat16), w1_ref[...],
                preferred_element_type=jnp.float32) + b1_ref[...]
    h = _leaky_relu(h)

    h = jnp.dot(h.astype(jnp.bfloat16), w2_ref[...],
                preferred_element_type=jnp.float32) + b2_ref[...]
    h = _leaky_relu(h)                                    # (tile_b, 32) f32

    # Final 32 -> 1 layer, emitted lane-dense: (1,32) @ (32,tile_b) gives a
    # (1, tile_b) row so the output store is lane-dense instead of a narrow
    # (tile_b, 1) column of masked partial stores.
    out = jnp.dot(w3_ref[...], h.T,
                  preferred_element_type=jnp.float32) + b3_ref[...]
    o_ref[...] = out.astype(o_ref.dtype)


def init_params(key):
    """Deterministic init matching nn.Linear default: U(-1/sqrt(fan_in), ...)."""
    dims = [(784, 128), (128, 64), (64, 32), (32, 1)]
    params = []
    for (fan_in, fan_out) in dims:
        key, kw, kb = jax.random.split(key, 3)
        bound = 1.0 / jnp.sqrt(jnp.float32(fan_in))
        w = jax.random.uniform(kw, (fan_in, fan_out), jnp.float32, -bound, bound)
        b = jax.random.uniform(kb, (1, fan_out), jnp.float32, -bound, bound)
        params += [w, b]
    return tuple(params)


def discriminator_forward(x, params, tile_b=1024):
    """x: [B, 1, 28, 28] or [B, 784] float32 -> [B, 1] float32."""
    B = x.shape[0]
    x2 = x.reshape(B, 28 * 28).astype(jnp.float32)

    # ---- batch-tile selection ------------------------------------------------
    if B <= tile_b:
        if _tensorcores_per_chip() >= 2 and B >= 256:
            # v7x (2 TCs): split mid-size batches so both cores get work.
            # Round to 128 so the lane-dense output tile stays 128-aligned.
            tile_b = _round_up(-(-B // 2), 128)
        else:
            # Single TensorCore (v5e/v6e) or small batch: one full-extent
            # tile, grid=1 — no extra per-step overhead, no padding copy.
            tile_b = B
    # else: large batch -> keep the big MXU-shaped tile; the ragged cdiv grid
    # handles the last tile without materializing a padded x copy in HBM.

    n_rows = x2.shape[0]
    num_tiles = (n_rows + tile_b - 1) // tile_b
    grid = (num_tiles,)

    w0, b0, w1, b1, w2, b2, w3, b3 = params
    w0b = w0.astype(jnp.bfloat16)
    w1b = w1.astype(jnp.bfloat16)
    w2b = w2.astype(jnp.bfloat16)
    w3r = w3.reshape(1, 32).astype(jnp.float32)   # row vector for the final layer
    b3r = b3.reshape(1, 1).astype(jnp.float32)

    out = pl.pallas_call(
        disc_kernel,
        out_shape=jax.ShapeDtypeStruct((1, num_tiles * tile_b), jnp.float32),
        grid_spec=pltpu.PrefetchScalarGridSpec(
            num_scalar_prefetch=0,
            grid=grid,
            in_specs=[
                pl.BlockSpec((tile_b, 784), lambda i: (i, 0)),   # x tile (f32)
                pl.BlockSpec((784, 128), lambda i: (0, 0)),      # W0 (bf16)
                pl.BlockSpec((1, 128), lambda i: (0, 0)),        # b0 (f32)
                pl.BlockSpec((128, 64), lambda i: (0, 0)),       # W1 (bf16)
                pl.BlockSpec((1, 64), lambda i: (0, 0)),         # b1 (f32)
                pl.BlockSpec((64, 32), lambda i: (0, 0)),        # W2 (bf16)
                pl.BlockSpec((1, 32), lambda i: (0, 0)),         # b2 (f32)
                pl.BlockSpec((1, 32), lambda i: (0, 0)),         # W3 row (f32)
                pl.BlockSpec((1, 1), lambda i: (0, 0)),          # b3 (f32)
            ],
            # Lane-dense output: one (1, tile_b) row per grid step.
            out_specs=pl.BlockSpec((1, tile_b), lambda i: (0, i)),
        ),
        compiler_params=pltpu.CompilerParams(
            dimension_semantics=("parallel",),
            vmem_limit_bytes=32 * 1024 * 1024),
    )(x2, w0b, b0, w1b, b1, w2b, b2, w3r, b3r)

    return out.reshape(-1, 1)[:B]


def _reference_forward(x, params):
    """Pure-JAX reference mirroring the kernel's bf16-input / f32-accum math."""
    w0, b0, w1, b1, w2, b2, w3, b3 = params
    h = x.reshape(x.shape[0], 784).astype(jnp.float32)

    def mm_bf16(a, w):
        return jnp.dot(a.astype(jnp.bfloat16), w.astype(jnp.bfloat16),
                       preferred_element_type=jnp.float32)

    h = _leaky_relu(mm_bf16(h, w0) + b0)
    h = _leaky_relu(mm_bf16(h, w1) + b1)
    h = _leaky_relu(mm_bf16(h, w2) + b2)
    return jnp.dot(h, w3) + b3            # final layer is f32, like the kernel


def _reference_forward_f32(x, params):
    """Full-precision reference (matches the original PyTorch f32 module)."""
    w0, b0, w1, b1, w2, b2, w3, b3 = params
    h = x.reshape(x.shape[0], 784).astype(jnp.float32)
    h = _leaky_relu(h @ w0 + b0)
    h = _leaky_relu(h @ w1 + b1)
    h = _leaky_relu(h @ w2 + b2)
    return h @ w3 + b3


if __name__ == "__main__":
    key = jax.random.PRNGKey(0)
    key, kx, kp, kx2 = jax.random.split(key, 4)

    params = init_params(kp)

    # Primary test: PyTorch-equivalent NCHW fashion-MNIST input, batch=2.
    x_small = jax.random.normal(kx, (2, 1, 28, 28), jnp.float32)
    out_small = jax.block_until_ready(discriminator_forward(x_small, params))
    assert out_small.shape == (2, 1)
    assert jnp.allclose(out_small, _reference_forward(x_small, params),
                        atol=1e-3, rtol=1e-3)
    assert jnp.allclose(out_small, _reference_forward_f32(x_small, params),
                        atol=5e-2, rtol=5e-2)

    # Secondary test: batch not a multiple of 8/128 -> exercises either the
    # single full-extent tile (1-TC chips) or the 2-way split with a ragged
    # last tile (2-TC chips).  No padded HBM copy of x in either path.
    x_big = jax.random.normal(kx2, (300, 1, 28, 28), jnp.float32)
    out_big = jax.block_until_ready(discriminator_forward(x_big, params))
    assert out_big.shape == (300, 1)
    assert jnp.allclose(out_big, _reference_forward(x_big, params),
                        atol=1e-3, rtol=1e-3)

    print("KERNEL_OK")
</pallas_src>

<mosaic_0001>
module attributes {stable_mosaic.version = 11 : i64} {
  func.func @disc_kernel(%arg0: i32, %arg1: memref<2x784xf32, #tpu.memory_space<vmem>>, %arg2: memref<784x128xbf16, #tpu.memory_space<vmem>>, %arg3: memref<1x128xf32, #tpu.memory_space<vmem>>, %arg4: memref<128x64xbf16, #tpu.memory_space<vmem>>, %arg5: memref<1x64xf32, #tpu.memory_space<vmem>>, %arg6: memref<64x32xbf16, #tpu.memory_space<vmem>>, %arg7: memref<1x32xf32, #tpu.memory_space<vmem>>, %arg8: memref<1x32xf32, #tpu.memory_space<vmem>>, %arg9: memref<1x1xf32, #tpu.memory_space<vmem>>, %arg10: memref<1x2xf32, #tpu.memory_space<vmem>>) attributes {dimension_semantics = [#tpu.dimension_semantics<parallel>], iteration_bounds = array<i64: 1>, scalar_prefetch = 0 : i64, scratch_operands = 0 : i64, tpu.core_type = #tpu.core_type<tc>, window_params = [{transform_indices = @transform_0, window_bounds = array<i64: 2, 784>}, {pipeline_mode = #tpu.pipeline_mode<synchronous>, transform_indices = @transform_1, window_bounds = array<i64: 784, 128>}, {pipeline_mode = #tpu.pipeline_mode<synchronous>, transform_indices = @transform_2, window_bounds = array<i64: 1, 128>}, {pipeline_mode = #tpu.pipeline_mode<synchronous>, transform_indices = @transform_3, window_bounds = array<i64: 128, 64>}, {pipeline_mode = #tpu.pipeline_mode<synchronous>, transform_indices = @transform_4, window_bounds = array<i64: 1, 64>}, {pipeline_mode = #tpu.pipeline_mode<synchronous>, transform_indices = @transform_5, window_bounds = array<i64: 64, 32>}, {pipeline_mode = #tpu.pipeline_mode<synchronous>, transform_indices = @transform_6, window_bounds = array<i64: 1, 32>}, {pipeline_mode = #tpu.pipeline_mode<synchronous>, transform_indices = @transform_7, window_bounds = array<i64: 1, 32>}, {pipeline_mode = #tpu.pipeline_mode<synchronous>, transform_indices = @transform_8, window_bounds = array<i64: 1, 1>}, {transform_indices = @transform_9, window_bounds = array<i64: 1, 2>}]} {
    %c0 = arith.constant 0 : index
    %c0_0 = arith.constant 0 : index
    %0 = vector.load %arg1[%c0, %c0_0] : memref<2x784xf32, #tpu.memory_space<vmem>>, vector<2x784xf32>
    %1 = arith.truncf %0 : vector<2x784xf32> to vector<2x784xbf16>
    %c0_1 = arith.constant 0 : index
    %c0_2 = arith.constant 0 : index
    %2 = vector.load %arg2[%c0_1, %c0_2] : memref<784x128xbf16, #tpu.memory_space<vmem>>, vector<784x128xbf16>
    %cst = arith.constant dense<0.000000e+00> : vector<2x128xf32>
    %3 = tpu.matmul %1, %2, %cst {dimension_numbers = #tpu.dot_dimension_numbers<[1], [0], [0], [1], [0, 0, 1, 1], [], []>} : vector<2x784xbf16>, vector<784x128xbf16>, vector<2x128xf32> -> vector<2x128xf32>
    %c0_3 = arith.constant 0 : index
    %c0_4 = arith.constant 0 : index
    %4 = vector.load %arg3[%c0_3, %c0_4] : memref<1x128xf32, #tpu.memory_space<vmem>>, vector<1x128xf32>
    %5 = vector.broadcast %4 : vector<1x128xf32> to vector<2x128xf32>
    %6 = arith.addf %3, %5 : vector<2x128xf32>
    %cst_5 = arith.constant 0.000000e+00 : f32
    %7 = vector.broadcast %cst_5 : f32 to vector<2x128xf32>
    %8 = arith.cmpf ogt, %6, %7 : vector<2x128xf32>
    %cst_6 = arith.constant 2.000000e-01 : f32
    %9 = vector.broadcast %cst_6 : f32 to vector<2x128xf32>
    %10 = arith.mulf %9, %6 : vector<2x128xf32>
    %11 = arith.select %8, %6, %10 : vector<2x128xi1>, vector<2x128xf32>
    %12 = arith.truncf %11 : vector<2x128xf32> to vector<2x128xbf16>
    %c0_7 = arith.constant 0 : index
    %c0_8 = arith.constant 0 : index
    %13 = vector.load %arg4[%c0_7, %c0_8] : memref<128x64xbf16, #tpu.memory_space<vmem>>, vector<128x64xbf16>
    %cst_9 = arith.constant dense<0.000000e+00> : vector<2x64xf32>
    %14 = tpu.matmul %12, %13, %cst_9 {dimension_numbers = #tpu.dot_dimension_numbers<[1], [0], [0], [1], [0, 0, 1, 1], [], []>} : vector<2x128xbf16>, vector<128x64xbf16>, vector<2x64xf32> -> vector<2x64xf32>
    %c0_10 = arith.constant 0 : index
    %c0_11 = arith.constant 0 : index
    %15 = vector.load %arg5[%c0_10, %c0_11] : memref<1x64xf32, #tpu.memory_space<vmem>>, vector<1x64xf32>
    %16 = vector.broadcast %15 : vector<1x64xf32> to vector<2x64xf32>
    %17 = arith.addf %14, %16 : vector<2x64xf32>
    %cst_12 = arith.constant 0.000000e+00 : f32
    %18 = vector.broadcast %cst_12 : f32 to vector<2x64xf32>
    %19 = arith.cmpf ogt, %17, %18 : vector<2x64xf32>
    %cst_13 = arith.constant 2.000000e-01 : f32
    %20 = vector.broadcast %cst_13 : f32 to vector<2x64xf32>
    %21 = arith.mulf %20, %17 : vector<2x64xf32>
    %22 = arith.select %19, %17, %21 : vector<2x64xi1>, vector<2x64xf32>
    %23 = arith.truncf %22 : vector<2x64xf32> to vector<2x64xbf16>
    %c0_14 = arith.constant 0 : index
    %c0_15 = arith.constant 0 : index
    %24 = vector.load %arg6[%c0_14, %c0_15] : memref<64x32xbf16, #tpu.memory_space<vmem>>, vector<64x32xbf16>
    %cst_16 = arith.constant dense<0.000000e+00> : vector<2x32xf32>
    %25 = tpu.matmul %23, %24, %cst_16 {dimension_numbers = #tpu.dot_dimension_numbers<[1], [0], [0], [1], [0, 0, 1, 1], [], []>} : vector<2x64xbf16>, vector<64x32xbf16>, vector<2x32xf32> -> vector<2x32xf32>
    %c0_17 = arith.constant 0 : index
    %c0_18 = arith.constant 0 : index
    %26 = vector.load %arg7[%c0_17, %c0_18] : memref<1x32xf32, #tpu.memory_space<vmem>>, vector<1x32xf32>
    %27 = vector.broadcast %26 : vector<1x32xf32> to vector<2x32xf32>
    %28 = arith.addf %25, %27 : vector<2x32xf32>
    %cst_19 = arith.constant 0.000000e+00 : f32
    %29 = vector.broadcast %cst_19 : f32 to vector<2x32xf32>
    %30 = arith.cmpf ogt, %28, %29 : vector<2x32xf32>
    %cst_20 = arith.constant 2.000000e-01 : f32
    %31 = vector.broadcast %cst_20 : f32 to vector<2x32xf32>
    %32 = arith.mulf %31, %28 : vector<2x32xf32>
    %33 = arith.select %30, %28, %32 : vector<2x32xi1>, vector<2x32xf32>
    %c0_21 = arith.constant 0 : index
    %c0_22 = arith.constant 0 : index
    %34 = vector.load %arg8[%c0_21, %c0_22] : memref<1x32xf32, #tpu.memory_space<vmem>>, vector<1x32xf32>
    %35 = tpu.transpose %33, [1, 0] : vector<2x32xf32> -> vector<32x2xf32>
    %cst_23 = arith.constant dense<0.000000e+00> : vector<1x2xf32>
    %36 = tpu.matmul %34, %35, %cst_23 {dimension_numbers = #tpu.dot_dimension_numbers<[1], [0], [0], [1], [0, 0, 1, 1], [], []>} : vector<1x32xf32>, vector<32x2xf32>, vector<1x2xf32> -> vector<1x2xf32>
    %c0_24 = arith.constant 0 : index
    %c0_25 = arith.constant 0 : index
    %37 = vector.load %arg9[%c0_24, %c0_25] : memref<1x1xf32, #tpu.memory_space<vmem>>, vector<1x1xf32>
    %38 = vector.broadcast %37 : vector<1x1xf32> to vector<1x2xf32>
    %39 = arith.addf %36, %38 : vector<1x2xf32>
    %c0_26 = arith.constant 0 : index
    %c0_27 = arith.constant 0 : index
    %40 = vector.load %arg10[%c0_26, %c0_27] : memref<1x2xf32, #tpu.memory_space<vmem>>, vector<1x2xf32>
    tpu.vector_store %arg10[%c0_26, %c0_27], %39 {strides = array<i32>} : memref<1x2xf32, #tpu.memory_space<vmem>>, vector<1x2xf32>,
    return
  }
  func.func @transform_0(%arg0: i32) -> (i32, i32) {
    %c0_i32 = arith.constant 0 : i32
    %c0_i32_0 = arith.constant 0 : i32
    return %arg0, %c0_i32 : i32, i32
  }
  func.func @transform_1(%arg0: i32) -> (i32, i32) {
    %c0_i32 = arith.constant 0 : i32
    %c0_i32_0 = arith.constant 0 : i32
    %c0_i32_1 = arith.constant 0 : i32
    return %c0_i32, %c0_i32_0 : i32, i32
  }
  func.func @transform_2(%arg0: i32) -> (i32, i32) {
    %c0_i32 = arith.constant 0 : i32
    %c0_i32_0 = arith.constant 0 : i32
    %c0_i32_1 = arith.constant 0 : i32
    return %c0_i32, %c0_i32_0 : i32, i32
  }
  func.func @transform_3(%arg0: i32) -> (i32, i32) {
    %c0_i32 = arith.constant 0 : i32
    %c0_i32_0 = arith.constant 0 : i32
    %c0_i32_1 = arith.constant 0 : i32
    return %c0_i32, %c0_i32_0 : i32, i32
  }
  func.func @transform_4(%arg0: i32) -> (i32, i32) {
    %c0_i32 = arith.constant 0 : i32
    %c0_i32_0 = arith.constant 0 : i32
    %c0_i32_1 = arith.constant 0 : i32
    return %c0_i32, %c0_i32_0 : i32, i32
  }
  func.func @transform_5(%arg0: i32) -> (i32, i32) {
    %c0_i32 = arith.constant 0 : i32
    %c0_i32_0 = arith.constant 0 : i32
    %c0_i32_1 = arith.constant 0 : i32
    return %c0_i32, %c0_i32_0 : i32, i32
  }
  func.func @transform_6(%arg0: i32) -> (i32, i32) {
    %c0_i32 = arith.constant 0 : i32
    %c0_i32_0 = arith.constant 0 : i32
    %c0_i32_1 = arith.constant 0 : i32
    return %c0_i32, %c0_i32_0 : i32, i32
  }
  func.func @transform_7(%arg0: i32) -> (i32, i32) {
    %c0_i32 = arith.constant 0 : i32
    %c0_i32_0 = arith.constant 0 : i32
    %c0_i32_1 = arith.constant 0 : i32
    return %c0_i32, %c0_i32_0 : i32, i32
  }
  func.func @transform_8(%arg0: i32) -> (i32, i32) {
    %c0_i32 = arith.constant 0 : i32
    %c0_i32_0 = arith.constant 0 : i32
    %c0_i32_1 = arith.constant 0 : i32
    return %c0_i32, %c0_i32_0 : i32, i32
  }
  func.func @transform_9(%arg0: i32) -> (i32, i32) {
    %c0_i32 = arith.constant 0 : i32
    %c0_i32_0 = arith.constant 0 : i32
    return %c0_i32, %arg0 : i32, i32
  }
}

</mosaic_0001>

<bundles_post_ra>
// kernel: tpu_custom_call.1
= control target key start
LH: loop header
LB: loop body
LE: loop exit
PB: predicated region body
PF: predicated region fallthrough
CT: control target
= control target key end

     0   :  { %s1454_s0 = inlined_call_operand.vmem [shape: f32[2,784], index: 0, kind: input, shape index: {}]   ;;  %s1455_s1 = inlined_call_operand.hbm [shape: bf16[784,128], index: 1, kind: input, shape index: {}]   ;;  %s1456_s2 = inlined_call_operand.vmem [shape: f32[1,128], index: 2, kind: input, shape index: {}]   ;;  %s1457_s3 = inlined_call_operand.vmem [shape: bf16[128,64], index: 3, kind: input, shape index: {}]   ;;  %s1458_s4 = inlined_call_operand.vmem [shape: f32[1,64], index: 4, kind: input, shape index: {}]   ;;  %s1459_s5 = inlined_call_operand.vmem [shape: bf16[64,32], index: 5, kind: input, shape index: {}]   ;;  %s1460_s6 = inlined_call_operand.vmem [shape: f32[1,32], index: 6, kind: input, shape index: {}]   ;;  %s1461_s7 = inlined_call_operand.vmem [shape: f32[1,32], index: 7, kind: input, shape index: {}]   ;;  %s1462_s8 = inlined_call_operand.<no memory space> [shape: f32[1,1], index: 8, kind: input, shape index: {}]   ;;  %s1463_s9 = inlined_call_operand.hbm [shape: f32[1,2], index: 9, kind: output, shape index: {}]  }
   0x1   :  { %v14_v0 = vstv %s1462_s8 }
   0x2   :  { %15 = vst [vmem:[#allocation2] sm:$0x1] %v14_v0 }
   0x3   :  { %16 = vsyncpa [#allocation4], 0 }
   0x4   :  { %17 = vsyncpa [#allocation5], 0  ;;  %s1289_s11 = smov [#allocation3]   ;;  %s1241_s15 = scalar_lea.hbm %s1455_s1, 6272 }
   0x5   :  { %s25_s12 = sshll.u32 %s1289_s11, 4  ;;  %p1242_p0 = scmp.ne.s32.totalorder %s1455_s1, %s1241_s15  ;;  %s26_s12 = int_to_ptr.vmem [resolvable:$true] %s25_s12 }
   0x6   :  { %p1245_p1 = scmp.lt.u32.totalorder %s1241_s15, %s1455_s1 }
   0x8   :  { %p1247_p2 = pnand %p1245_p1, %p1242_p0 }
   0xa   :  { %1250 = shalt.err (!%p1247_p2)
}
   0xb   :  { %s1251_s8 = scalar_lea.vmem %s26_s12, 6272  ;;  %p1256_p4 = scmp.lt.s32.totalorder %s26_s12, %s26_s12 }
   0xc   :  { %p1252_p3 = scmp.ne.s32.totalorder %s26_s12, %s1251_s8  ;;  %p1257_p5 = scmp.lt.s32.totalorder %s1251_s8, %s1251_s8 }
   0xe   :  { %p1258_p6 = por %p1257_p5, %p1256_p4 }
  0x10   :  { %p1259_p7 = pnand %p1258_p6, %p1252_p3 }
  0x12   :  { %1262 = shalt.err (!%p1259_p7)
}
  0x13   :  { %s1290_s20 = smov 64   ;;  %s1291_s21 = smov 4  }
  0x14   :  { %31 = dma.hbm_to_vmem [thread:$0]  %s1455_s1, 6272, %s26_s12, [#allocation4], %s1290_s20, %s1290_s20, %s1291_s21  }
  0x15   :  { %1285 = dma.done.wait [#allocation4], 6272  }
  0x16   :  { %1286 = vsyncadd [#allocation4], 4294961024  ;;  %v1178_v1 = vld [vmem:[#allocation3 + $0x40] sm:$0xff]   ;;  %v1182_v5 = vld [vmem:[#allocation3 + $0x48] sm:$0xff]   ;;  %v1292_v22 = vmov 1983009808   ;;  %v58_v24 = vlaneseq }
  0x17   :  { %v1179_v2 = vld [vmem:[#allocation3] sm:$0xff]   ;;  %1042 = vmatprep.subr.bf16.mxu0 %v1178_v1  ;;  %v1183_v6 = vld [vmem:[#allocation3 + $0x8] sm:$0xff]   ;;  %v1186_v9 = vld [vmem:[#allocation3 + $0x50] sm:$0xff]   ;;  %v56_v23 = vunpack.c.l.s4 %v1292_v22  ;;  %v1293_v46 = vmov 0.0   ;;  %vm1294_vm0 = vmmov 0   ;;  %vm500_vm1 = vcmask 130048  }
  0x18   :  { %v1180_v3 = vld [vmem:[#allocation3 + $0xc0] sm:$0xff]   ;;  %1043 = vmatpush3.bf16.msra.mxu0 %v1179_v2  ;;  %v1184_v7 = vld [vmem:[#allocation3 + $0xc8] sm:$0xff]   ;;  %v1187_v10 = vld [vmem:[#allocation3 + $0x10] sm:$0xff]   ;;  %v1362_v30 = vshrl.u32 %v58_v24, 7  ;;  %vm822_vm4 = vcmask 523264   ;;  %vm880_vm6 = vcmask 261120  }
  0x19   :  { %v1181_v4 = vld [vmem:[#allocation3 + $0x80] sm:$0xff]   ;;  %1064 = vmatprep.subr.bf16.mxu1 %v1180_v3  ;;  %1044 = vmatprep.subr.bf16.mxu0 %v1182_v5  ;;  %v1185_v8 = vld [vmem:[#allocation3 + $0x88] sm:$0xff]   ;;  %v1188_v11 = vld [vmem:[#allocation3 + $0xd0] sm:$0xff]   ;;  %v57_v29 = vunpack.c.0.s8 %v56_v23  ;;  %vm957_vm7 = vcmask 8192  }
  0x1a   :  { %1065 = vmatpush3.bf16.msra.mxu1 %v1181_v4  ;;  %v1189_v12 = vld [vmem:[#allocation3 + $0x90] sm:$0xff]   ;;  %v1190_v13 = vld [vmem:[#allocation3 + $0x58] sm:$0xff]   ;;  %v1194_v17 = vld [vmem:[#allocation3 + $0x60] sm:$0xff]  }
  0x1b   :  { %1066 = vmatprep.subr.bf16.mxu1 %v1184_v7  ;;  %v1191_v14 = vld [vmem:[#allocation3 + $0x18] sm:$0xff]   ;;  %v1195_v18 = vld [vmem:[#allocation3 + $0x20] sm:$0xff]   ;;  %v1198_v21 = vld [vmem:[#allocation3 + $0x68] sm:$0xff]   ;;  %v60_v35 = vsub.s32 %v57_v29, %v1362_v30 }
  0x1c   :  { %1045 = vmatpush3.bf16.msra.mxu0 %v1183_v6  ;;  %v1192_v15 = vld [vmem:[#allocation3 + $0xd8] sm:$0xff]   ;;  %v1196_v19 = vld [vmem:[#allocation3 + $0xe0] sm:$0xff]   ;;  %v1199_v25 = vld [vmem:[#allocation3 + $0x28] sm:$0xff]  }
  0x1d   :  { %1046 = vmatprep.subr.bf16.mxu0 %v1186_v9  ;;  %v1193_v16 = vld [vmem:[#allocation3 + $0x98] sm:$0xff]   ;;  %v1197_v20 = vld [vmem:[#allocation3 + $0xa0] sm:$0xff]   ;;  %v1200_v26 = vld [vmem:[#allocation3 + $0xe8] sm:$0xff]  }
  0x1e   :  { %1067 = vmatpush3.bf16.msra.mxu1 %v1185_v8  ;;  %v1201_v27 = vld [vmem:[#allocation3 + $0xa8] sm:$0xff]   ;;  %v1202_v28 = vld [vmem:[#allocation3 + $0x70] sm:$0xff]   ;;  %v1206_v34 = vld [vmem:[#allocation3 + $0x78] sm:$0xff]  }
  0x1f   :  { %1068 = vmatprep.subr.bf16.mxu1 %v1188_v11  ;;  %v1203_v31 = vld [vmem:[#allocation3 + $0x30] sm:$0xff]   ;;  %v1207_v36 = vld [vmem:[#allocation3 + $0x38] sm:$0xff]   ;;  %v1210_v42 = vld [vmem:[#allocation3 + $0x140] sm:$0xff]  }
  0x20   :  { %1047 = vmatpush3.bf16.msra.mxu0 %v1187_v10  ;;  %v1204_v32 = vld [vmem:[#allocation3 + $0xf0] sm:$0xff]   ;;  %v1208_v37 = vld [vmem:[#allocation3 + $0xf8] sm:$0xff]   ;;  %v1212_v49 = vld [vmem:[#allocation3 + $0x100] sm:$0xff]  }
  0x21   :  { %1048 = vmatprep.subr.bf16.mxu0 %v1190_v13  ;;  %v1205_v33 = vld [vmem:[#allocation3 + $0xb0] sm:$0xff]   ;;  %v50_v38 = vld [vmem:[%s1454_s0] sm:$0xff]  ;;  %v1213_v51 = vld [vmem:[#allocation3 + $0x148] sm:$0xff]  }
  0x22   :  { %1069 = vmatpush3.bf16.msra.mxu1 %v1189_v12  ;;  %v61_v39 = vrot.slane %v50_v38, %v60_v35  ;;  %v1209_v40 = vld [vmem:[#allocation3 + $0xb8] sm:$0xff]   ;;  %v54_v41 = vcombine.high %v50_v38, %v50_v38  ;;  %v1214_v53 = vld [vmem:[#allocation3 + $0x108] sm:$0xff]   ;;  %v1215_v54 = vld [vmem:[#allocation3 + $0x150] sm:$0xff]  }
  0x23   :  { %1070 = vmatprep.subr.bf16.mxu1 %v1192_v15  ;;  %v1216_v55 = vld [vmem:[#allocation3 + $0x110] sm:$0xff]   ;;  %v1217_v56 = vld [vmem:[#allocation3 + $0x158] sm:$0xff]   ;;  %v1219_v58 = vld [vmem:[#allocation3 + $0x160] sm:$0xff]  }
  0x24   :  { %1049 = vmatpush3.bf16.msra.mxu0 %v1191_v14  ;;  %v69_v43 = vcombine.high %v61_v39, %v61_v39  ;;  %v68_v44 = vrot.slane %v54_v41, %v60_v35  ;;  %v94_v45 = vpack.c.bf16 %v61_v39, %v61_v39  ;;  %v1218_v57 = vld [vmem:[#allocation3 + $0x118] sm:$0xff]   ;;  %v51_v59 = vld [vmem:[%s1454_s0 + $0x8] sm:$0x3f]  ;;  %v1223_v6 = vld [vmem:[#allocation3 + $0x170] sm:$0xff]  }
  0x25   :  { %1050 = vmatprep.subr.bf16.mxu0 %v1194_v17  ;;  %v71_v60 = vcombine.high %v51_v59, %v51_v59  ;;  %v78_v61 = vrot.slane %v51_v59, %v60_v35  ;;  %v1228_v62 = vld [vmem:[#allocation3 + $0x180] sm:$0xff]   ;;  %v1221_v0 = vld [vmem:[#allocation3 + $0x168] sm:$0xff]   ;;  %v1224_v7 = vld [vmem:[#allocation3 + $0x130] sm:$0xff]  }
  0x26   :  { %1071 = vmatpush3.bf16.msra.mxu1 %v1193_v16  ;;  %v95_v47 = vpack.c.bf16 %v69_v43, %v69_v43  ;;  %v70_v48 = vcombine.high %v68_v44, %v68_v44  ;;  %v96_v50 = vpack.c.bf16 %v68_v44, %v68_v44  ;;  %v1220_v63 = vld [vmem:[#allocation3 + $0x120] sm:$0xff]   ;;  %v1222_v5 = vld [vmem:[#allocation3 + $0x128] sm:$0xff]   ;;  %v1225_v8 = vld [vmem:[#allocation3 + $0x178] sm:$0xff]  }
  0x27   :  { %1072 = vmatprep.subr.bf16.mxu1 %v1196_v19  ;;  %v85_v1 = vrot.slane %v71_v60, %v60_v35  ;;  %v86_v2 = vcombine.high %v78_v61, %v78_v61  ;;  %v1226_v9 = vld [vmem:[#allocation3 + $0x138] sm:$0xff]   ;;  %v98_v10 = vpack.c.bf16 %v78_v61, %v78_v61  ;;  %v1230_v12 = vld [vmem:[%s1457_s3 + $0x8] sm:$0xff]   ;;  %v1231_v13 = vld [vmem:[%s1457_s3 + $0x10] sm:$0xff]   ;;  %v1295_v61 = vmov 0  }
  0x28   :  { %1051 = vmatpush3.bf16.msra.mxu0 %v1195_v18  ;;  %536 = vmatprep.mubr.bf16.mxu0 %v95_v47  ;;  %v97_v52 = vpack.c.bf16 %v70_v48, %v70_v48  ;;  %v1229_v11 = vld [vmem:[%s1457_s3] sm:$0xff]   ;;  %v1232_v14 = vld [vmem:[%s1457_s3 + $0x18] sm:$0xff]   ;;  %v1234_v16 = vld [vmem:[%s1457_s3 + $0x28] sm:$0xff]  }
  0x29   :  { %1052 = vmatprep.subr.bf16.mxu0 %v1198_v21  ;;  %v99_v3 = vpack.c.bf16 %v86_v2, %v86_v2  ;;  %v100_v4 = vpack.c.bf16 %v85_v1, %v85_v1  ;;  %v1233_v15 = vld [vmem:[%s1457_s3 + $0x20] sm:$0xff]   ;;  %v1235_v17 = vld [vmem:[%s1457_s3 + $0x30] sm:$0xff]   ;;  %v1236_v18 = vld [vmem:[%s1457_s3 + $0x38] sm:$0xff]   ;;  %1177 = vset.pattern.permute.xlu0 %v1295_v61 }
  0x2a   :  { %1073 = vmatpush3.bf16.msra.mxu1 %v1197_v20  ;;  %576 = vmatprep.mubr.bf16.mxu1 %v97_v52  ;;  %v1237_v19 = vld [vmem:[%s1459_s5] sm:$0xff]   ;;  %v1238_v20 = vld [vmem:[%s1459_s5 + $0x8] sm:$0xff]  }
  0x2b   :  { %1074 = vmatprep.subr.bf16.mxu1 %v1200_v26  ;;  %v974_v22 = vld [vmem:[%s1456_s2] ss:$0 sm:$0xff] }
  0x2c   :  { %1053 = vmatpush3.bf16.msra.mxu0 %v1199_v25  ;;  %v1025_v52 = vld [vmem:[%s1458_s4] ss:$0 sm:$0xff] }
  0x2d   :  { %1054 = vmatprep.subr.bf16.mxu0 %v1202_v28 }
  0x2e   :  { %1075 = vmatpush3.bf16.msra.mxu1 %v1201_v27 }
  0x2f   :  { %1076 = vmatprep.subr.bf16.mxu1 %v1204_v32 }
  0x30   :  { %1055 = vmatpush3.bf16.msra.mxu0 %v1203_v31 }
  0x31   :  { %1056 = vmatprep.subr.bf16.mxu0 %v1206_v34 }
  0x32   :  { %1077 = vmatpush3.bf16.msra.mxu1 %v1205_v33 }
  0x33   :  { %1078 = vmatprep.subr.bf16.mxu1 %v1208_v37 }
  0x34   :  { %1057 = vmatpush3.bf16.msra.mxu0 %v1207_v36 }
  0x35   :  { %1086 = vmatprep.subr.bf16.mxu0 %v1210_v42 }
  0x36   :  { %1079 = vmatpush3.bf16.msra.mxu1 %v1209_v40 }
  0x37   :  { %1126 = vmatprep.subr.bf16.mxu1 %v1293_v46  ;;  %537 = vmatmul.mubr.bf16.vlgmr.msra.gmra.mrb[0].mxu0 %v94_v45 }
  0x38   :  { %1087 = vmatpush3.bf16.msra.mxu0 %v1212_v49  ;;  %616 = vmatprep.mubr.bf16.mxu0 %v99_v3 }
  0x39   :  { %577 = vmatmul.mubr.bf16.vlgmr.msra.gmra.mrb[0].mxu1 %v96_v50  ;;  %1088 = vmatprep.subr.bf16.mxu0 %v1213_v51  ;;  %v1239_v50 = vld [vmem:[%s1459_s5 + $0x10] sm:$0xff]   ;;  %v1240_v51 = vld [vmem:[%s1459_s5 + $0x18] sm:$0xff]  }
  0x3a   :  { %1128 = vmatprep.mubr.msk.bf16.mxu1 %vm1294_vm0, %v1293_v46  ;;  %1127 = vmatpush3.bf16.msra.mxu1 %v1228_v62  ;;  %v1034_v62 = vld [vmem:[%s1460_s6] ss:$0 sm:$0xff]  ;;  %s1296_s6 = smov [#allocation6]  }
  0x3b   :  { %1132 = vmatprep.subr.bf16.mxu1 %v1293_v46  ;;  %s965_s30 = sshll.u32 %s1296_s6, 4  ;;  %s966_s30 = int_to_ptr.vmem [resolvable:$true] %s965_s30 }
  0x3c   :  { %1089 = vmatpush3.bf16.msra.mxu0 %v1214_v53  ;;  %s1263_s10 = scalar_lea.vmem %s966_s30, 16  ;;  %s1267_s11 = scalar_lea.vmem %s966_s30, 32 }
  0x3d   :  { %1090 = vmatprep.subr.bf16.mxu0 %v1215_v54  ;;  %p1264_p8 = scmp.ne.s32.totalorder %s966_s30, %s1263_s10  ;;  %p1268_p9 = scmp.lt.s32.totalorder %s966_s30, %s966_s30 }
  0x3e   :  { %p1269_p10 = scmp.lt.s32.totalorder %s1267_s11, %s1263_s10 }
  0x40   :  { %1091 = vmatpush3.bf16.msra.mxu0 %v1216_v55  ;;  %p1270_p11 = por %p1269_p10, %p1268_p9 }
  0x41   :  { %1092 = vmatprep.subr.bf16.mxu0 %v1217_v56  ;;  %1129 = vmatmul.mubr.msk.bf16.vlgmr.msra.gmra.mrb[4].mxu1 %vm500_vm1, %v100_v4 }
  0x42   :  { %1148 = vmatprep.mubr.msk.bf16.mxu1 %vm1294_vm0, %v1293_v46  ;;  %1133 = vmatpush3.bf16.msra.mxu1 %v1229_v11  ;;  %p1271_p12 = pnand %p1270_p11, %p1264_p8 }
  0x43   :  { %1134 = vmatprep.subr.bf16.mxu1 %v1293_v46 }
  0x44   :  { %1093 = vmatpush3.bf16.msra.mxu0 %v1218_v57 }
  0x45   :  { %1094 = vmatprep.subr.bf16.mxu0 %v1219_v58 }
  0x46   :  { %1135 = vmatpush3.bf16.msra.mxu1 %v1230_v12 }
  0x47   :  { %1136 = vmatprep.subr.bf16.mxu1 %v1293_v46 }
  0x48   :  { %1095 = vmatpush3.bf16.msra.mxu0 %v1220_v63 }
  0x49   :  { %1096 = vmatprep.subr.bf16.mxu0 %v1221_v0 }
  0x4a   :  { %1137 = vmatpush3.bf16.msra.mxu1 %v1231_v13 }
  0x4b   :  { %1138 = vmatprep.subr.bf16.mxu1 %v1293_v46 }
  0x4c   :  { %1097 = vmatpush3.bf16.msra.mxu0 %v1222_v5 }
  0x4d   :  { %1098 = vmatprep.subr.bf16.mxu0 %v1223_v6  ;;  %v869_v6 = vld [vmem:[%s1461_s7] sm:$0x1] }
  0x4e   :  { %1139 = vmatpush3.bf16.msra.mxu1 %v1232_v14 }
  0x4f   :  { %1140 = vmatprep.subr.bf16.mxu1 %v1293_v46 }
  0x50   :  { %1099 = vmatpush3.bf16.msra.mxu0 %v1224_v7  ;;  %v878_v7 = vsub.s32 0, %v1362_v30 }
  0x51   :  { %1100 = vmatprep.subr.bf16.mxu0 %v1225_v8 }
  0x52   :  { %1141 = vmatpush3.bf16.msra.mxu1 %v1233_v15 }
  0x53   :  { %1142 = vmatprep.subr.bf16.mxu1 %v1293_v46 }
  0x54   :  { %1101 = vmatpush3.bf16.msra.mxu0 %v1226_v9 }
  0x55   :  { %1152 = vmatprep.subr.bf16.mxu0 %v1293_v46 }
  0x56   :  { %1143 = vmatpush3.bf16.msra.mxu1 %v1234_v16 }
  0x57   :  { %617 = vmatmul.mubr.bf16.vlgmr.msra.gmra.mrb[4].mxu0 %v98_v10  ;;  %1144 = vmatprep.subr.bf16.mxu1 %v1293_v46 }
  0x58   :  { %1160 = vmatprep.mubr.msk.bf16.mxu0 %vm1294_vm0, %v1293_v46  ;;  %1153 = vmatpush3.bf16.msra.mxu0 %v1237_v19 }
  0x59   :  { %1154 = vmatprep.subr.bf16.mxu0 %v1293_v46 }
  0x5a   :  { %1145 = vmatpush3.bf16.msra.mxu1 %v1235_v17 }
  0x5b   :  { %1146 = vmatprep.subr.bf16.mxu1 %v1293_v46 }
  0x5c   :  { %1155 = vmatpush3.bf16.msra.mxu0 %v1238_v20 }
  0x5d   :  { %1156 = vmatprep.subr.bf16.mxu0 %v1293_v46 }
  0x5e   :  { %1147 = vmatpush3.bf16.msra.mxu1 %v1236_v18 }
  0x5f   :  { %1164 = vmatprep.subr.mxu1 %v1293_v46 }
  0x60   :  { %1157 = vmatpush3.bf16.msra.mxu0 %v1239_v50 }
  0x61   :  { %1158 = vmatprep.subr.bf16.mxu0 %v1293_v46 }
  0x64   :  { %1159 = vmatpush3.bf16.msra.mxu0 %v1240_v51 }
 0x10a   :  { %v1058_v21 = vpop.f32.mrb[0].mxu0 }
 0x10b   :  { %v1059_v23 = vpop.f32.mrb[1].mxu0 }
 0x10c   :  { %v1060_v24 = vadd.f32 %v1059_v23, %v1058_v21  ;;  %v1061_v25 = vpop.f32.mrb[2].mxu0  ;;  %v1080_v26 = vpop.f32.mrb[0].mxu1 }
 0x10d   :  { %v1062_v27 = vpop.f32.mrb[3].mxu0  ;;  %v1081_v28 = vpop.f32.mrb[1].mxu1 }
 0x10e   :  { %v539_v29 = vadd.f32 %v1060_v24, %v974_v22  ;;  %v1082_v31 = vadd.f32 %v1081_v28, %v1080_v26  ;;  %v1083_v32 = vpop.f32.mrb[2].mxu1 }
 0x10f   :  { %v1084_v33 = vpop.f32.mrb[3].mxu1 }
 0x110   :  { %v579_v34 = vadd.f32 %v1082_v31, %v539_v29 }
 0x114   :  { %v658_v35 = vpop.f32.mrb[4].mxu1 }
 0x115   :  { %v1130_v36 = vpop.f32.mrb[5].mxu1 }
 0x116   :  { %v661_v37 = vpop.f32.mrb[6].mxu1 }
 0x117   :  { %v1131_v38 = vpop.f32.mrb[7].mxu1 }
 0x12a   :  { %v1102_v39 = vpop.f32.mrb[4].mxu0 }
 0x12b   :  { %v1103_v40 = vpop.f32.mrb[5].mxu0 }
 0x12c   :  { %v1104_v41 = vadd.f32 %v1103_v40, %v1102_v39  ;;  %v1105_v42 = vpop.f32.mrb[6].mxu0 }
 0x12d   :  { %v1106_v43 = vpop.f32.mrb[7].mxu0 }
 0x12e   :  { %v619_v44 = vadd.f32 %v1104_v41, %v579_v34 }
 0x130   :  { %v659_v45 = vadd.f32 %v658_v35, %v619_v44 }
 0x132   :  { %vm664_vm2 = vcmp.gt.f32.partialorder %v659_v45, 0.0  ;;  %v665_v47 = vmul.f32 0.2, %v659_v45 }
 0x134   :  { %v666_v48 = vsel %vm664_vm2, %v659_v45, %v665_v47 }
 0x135   :  { %v667_v49 = vpack.c.bf16 %v666_v48, %v666_v48 }
 0x137   :  { %1149 = vmatmul.mubr.bf16.vlgmr.msra.gmra.mrb[8].mxu1 %v667_v49 }
 0x138   :  { %1166 = vmatprep.mubr.msk.f32.mxu1 %vm1294_vm0, %v1293_v46  ;;  %v870_v46 = vld [vmem:[#allocation2] sm:$0x1] }
 0x139   :  { %873 = vperm.xlu0 %1177, %v870_v46  }
 0x1b8   :  { %v874_v8 = vpop.permute.xlu0 %873 }
 0x1b9   :  { %v879_v9 = vrot.slane %v874_v8, %v878_v7 }
 0x20a   :  { %v773_v53 = vpop.f32.mrb[8].mxu1 }
 0x20b   :  { %v774_v54 = vadd.f32 %v1025_v52, %v773_v53  ;;  %v1150_v55 = vpop.f32.mrb[9].mxu1 }
 0x20c   :  { %v776_v56 = vpop.f32.mrb[10].mxu1 }
 0x20d   :  { %vm779_vm3 = vcmp.gt.f32.partialorder %v774_v54, 0.0  ;;  %v780_v57 = vmul.f32 0.2, %v774_v54  ;;  %v1151_v58 = vpop.f32.mrb[11].mxu1 }
 0x20f   :  { %v781_v59 = vsel %vm779_vm3, %v774_v54, %v780_v57 }
 0x210   :  { %v782_v60 = vpack.c.bf16 %v781_v59, %v781_v59 }
 0x212   :  { %1161 = vmatmul.mubr.msk.bf16.vlgmr.msra.gmra.mrb[8].mxu0 %vm822_vm4, %v782_v60 }
 0x2e5   :  { %v860_v63 = vpop.f32.mrb[8].mxu0 }
 0x2e6   :  { %v861_v0 = vadd.f32 %v1034_v62, %v860_v63  ;;  %v1162_v1 = vpop.f32.mrb[9].mxu0 }
 0x2e7   :  { %v863_v2 = vpop.f32.mrb[10].mxu0 }
 0x2e8   :  { %vm866_vm5 = vcmp.gt.f32.partialorder %v861_v0, 0.0  ;;  %v867_v3 = vmul.f32 0.2, %v861_v0  ;;  %v1163_v4 = vpop.f32.mrb[11].mxu0 }
 0x2ea   :  { %v868_v5 = vsel %vm866_vm5, %v861_v0, %v867_v3 }
 0x2eb   :  { %1165 = vmatpush3.xpose.msk.msra.mxu1 %vm880_vm6, %v868_v5 }
 0x2ee   :  { %1167 = vmatmul.mubr.msk.f32.vlgmr.msra.gmra.mrb[12].mxu1 %vm880_vm6, %v869_v6 }
 0x3c1   :  { %v953_v10 = vpop.f32.mrb[12].mxu1 }
 0x3c2   :  { %v954_v11 = vadd.f32 %v953_v10, %v879_v9  ;;  %v1168_v12 = vpop.f32.mrb[13].mxu1 }
 0x3c4   :  { %958 = vst.msk [vmem:[#allocation6] sm:$0x1] %vm957_vm7, %v954_v11 }
 0x3c5   :  { %1274 = shalt.err (!%p1271_p12)
}
 0x3c6   :  { %s1275_s13 = scalar_lea.hbm %s1463_s9, 16 }
 0x3c7   :  { %p1276_p13 = scmp.ne.s32.totalorder %s1463_s9, %s1275_s13  ;;  %p1279_p0 = scmp.lt.u32.totalorder %s1275_s13, %s1463_s9 }
 0x3c9   :  { %p1281_p1 = pnand %p1279_p0, %p1276_p13 }
 0x3cb   :  { %1284 = shalt.err (!%p1281_p1)
}
 0x3cc   :  { %968 = dma.vmem_to_hbm [thread:$0]  %s966_s30, 16, %s1463_s9, [#allocation5]  }
 0x3cd   :  { %1287 = dma.done.wait [#allocation5], 16  }
 0x3ce   :  { %1288 = vsyncadd [#allocation5], 4294967280 }
 0x3cf   :  { %972 = vsyncpa [#allocation4], 1 }
 0x3d0   :  { %973 = vsyncpa [#allocation5], 1 }

</bundles_post_ra>
